<compile_context>
chip_gen: v7x
topology: tpu7x:2x2x1
jax: 0.10.0
libtpu: 0.0.40
codegen_flags: <defaults>
</compile_context>

<pallas_src>
import math

import jax
import jax.numpy as jnp
from jax import lax
from jax.experimental import pallas as pl
from jax.experimental.pallas import tpu as pltpu


# ----------------------------- helpers (plain JAX) --------------------------

def _round_up(x, m):
    return ((x + m - 1) // m) * m


def _gelu(x):
    # TODO(synk): models.gelu source not provided; using the standard tanh-approx GELU.
    c = math.sqrt(2.0 / math.pi)
    return 0.5 * x * (1.0 + jnp.tanh(c * (x + 0.044715 * x * x * x)))


def _layer_norm(x, g, b, eps=1e-5):
    mu = jnp.mean(x, axis=-1, keepdims=True)
    var = jnp.mean((x - mu) ** 2, axis=-1, keepdims=True)
    return (x - mu) * lax.rsqrt(var + eps) * g + b


def _vmem_limit_bytes():
    """Per-generation VMEM budget: ~3/4 of physical, capped (v5e/v6e: 96 MiB, v7x: 48 MiB)."""
    try:
        cap = pltpu.get_tpu_info().vmem_capacity_bytes
    except Exception:                      # non-TPU / interpret fallback
        cap = 64 * 1024 * 1024
    return int(min(cap * 3 // 4, 96 * 1024 * 1024))


def _resident(block_shape, index_map):
    """BlockSpec for grid-invariant (constant index_map) blocks.

    Single-buffers the block when pipeline_mode/Buffered is available (halves the
    resident VMEM of the weight blocks); falls back to the default spec otherwise.
    """
    if hasattr(pl, "Buffered"):
        try:
            return pl.BlockSpec(block_shape, index_map, pipeline_mode=pl.Buffered(1))
        except TypeError:
            pass
    return pl.BlockSpec(block_shape, index_map)


# Set to jnp.bfloat16 to halve the dominant (M, V) logits HBM writeback if the
# downstream loss tolerates it; f32 preserves the PyTorch reference semantics.
_LM_LOGITS_DTYPE = jnp.float32


# ----------------------------- Pallas kernels -------------------------------
# MLM head is split into two pipelined pallas_calls:
#   stage A (stem) : per M-tile  z = gelu(x @ Wlin^T + b); zn = LayerNorm(z);
#                    y = zn @ W2                                  -> (TM_A, E) bf16
#   stage B (vocab): per (V,M)-tile  logits = y @ W1T + decoder_bias, vocab axis OUTER
# so gelu/LN/decoder1 run once per row tile and the big tied embedding weight
# (stored (E, V) bf16) is streamed through HBM exactly once.

def mlm_stem_kernel(hm_ref, wlin_ref, blin_ref, gamma_ref, beta_ref, w2_ref, y_ref):
    x = hm_ref[...].astype(jnp.bfloat16)                               # (TM, H)
    # linear: x @ Wlin^T   (Wlin is (H, H) bf16, PyTorch (out, in) layout)
    z = lax.dot_general(x, wlin_ref[...], (((1,), (1,)), ((), ())),
                        preferred_element_type=jnp.float32) + blin_ref[...]
    c = math.sqrt(2.0 / math.pi)
    z = 0.5 * z * (1.0 + jnp.tanh(c * (z + 0.044715 * z * z * z)))     # gelu (f32)
    # fused single-pass LayerNorm statistics (mean & mean-of-squares)
    mu = jnp.mean(z, axis=-1, keepdims=True)
    var = jnp.mean(z * z, axis=-1, keepdims=True) - mu * mu
    zn = (z - mu) * lax.rsqrt(var + 1e-5) * gamma_ref[...] + beta_ref[...]
    # decoder1: zn @ W2   (W2 = tok_embed2.weight (H, E) bf16; decoder1.weight = W2^T)
    y_ref[...] = jnp.dot(zn.astype(jnp.bfloat16), w2_ref[...],
                         preferred_element_type=jnp.float32).astype(y_ref.dtype)


def mlm_vocab_kernel(y_ref, w1t_ref, dbias_ref, out_ref):
    # decoder2: y @ W1T + decoder_bias; W1T streamed as lane-dense (E, TV) bf16 tiles.
    # TODO(synk): on v7x the streamed vocab weight could be fp8 (bf16 x fp8 MXU);
    # gated off here for accuracy parity with the fp32 PyTorch reference.
    out_ref[...] = (jnp.dot(y_ref[...], w1t_ref[...],
                            preferred_element_type=jnp.float32)
                    + dbias_ref[...]).astype(out_ref.dtype)


def pooled_fc_kernel(h0_ref, wfc_ref, bfc_ref, out_ref):
    p = lax.dot_general(h0_ref[...].astype(jnp.bfloat16), wfc_ref[...],
                        (((1,), (1,)), ((), ())),
                        preferred_element_type=jnp.float32) + bfc_ref[...]
    out_ref[...] = jnp.tanh(p)


# ----------------------------- wrappers --------------------------------------

def mlm_head(h_masked2d, w_lin_bf16, b_lin, gamma, beta, w2_bf16, w1t_bf16, d_bias):
    M, H = h_masked2d.shape
    E = w2_bf16.shape[1]
    V = w1t_bf16.shape[1]
    vmem_limit = _vmem_limit_bytes()

    # Row tiling: stage-A tile 256; stage-B tile decoupled and larger (512) so each
    # streamed W1 tile amortizes more MXU work. Pad M once to a multiple of both.
    if M > 256:
        TM_A, TM_B = 256, 512
        M_pad = _round_up(M, TM_B)
    else:
        TM_A = TM_B = _round_up(M, 8)
        M_pad = TM_A
    if M_pad != M:
        h_masked2d = jnp.pad(h_masked2d, ((0, M_pad - M), (0, 0)))
    TV = 2048 if V > 2048 else V
    grid_m_a = M_pad // TM_A
    grid_m_b = M_pad // TM_B
    grid_v = pl.cdiv(V, TV)

    # ---- stage A: gelu(linear) -> LayerNorm -> decoder1, once per row tile ----
    y = pl.pallas_call(
        mlm_stem_kernel,
        out_shape=jax.ShapeDtypeStruct((M_pad, E), jnp.bfloat16),
        grid=(grid_m_a,),
        in_specs=[
            pl.BlockSpec((TM_A, H), lambda i: (i, 0)),
            _resident((H, H), lambda i: (0, 0)),         # bf16 weight, single-buffered
            _resident((1, H), lambda i: (0, 0)),         # bias / gamma / beta resident
            _resident((1, H), lambda i: (0, 0)),
            _resident((1, H), lambda i: (0, 0)),
            _resident((H, E), lambda i: (0, 0)),         # bf16 decoder1 weight
        ],
        out_specs=pl.BlockSpec((TM_A, E), lambda i: (i, 0)),
        compiler_params=pltpu.CompilerParams(
            dimension_semantics=("parallel",),
            vmem_limit_bytes=vmem_limit),
        cost_estimate=pl.CostEstimate(
            flops=2 * M_pad * (H * H + H * E),
            transcendentals=2 * M_pad * H,
            bytes_accessed=4 * (M_pad * H + 3 * H) + 2 * (H * H + H * E + M_pad * E)),
    )(h_masked2d, w_lin_bf16, b_lin[None, :], gamma[None, :], beta[None, :], w2_bf16)

    # ---- stage B: vocab projection, vocab axis OUTER so W1T streams exactly once ----
    logits = pl.pallas_call(
        mlm_vocab_kernel,
        out_shape=jax.ShapeDtypeStruct((M_pad, V), _LM_LOGITS_DTYPE),
        grid=(grid_v, grid_m_b),                          # (outer: vocab, inner: rows)
        in_specs=[
            pl.BlockSpec((TM_B, E), lambda j, i: (i, 0)),  # small y block, re-fetched
            pl.BlockSpec((E, TV), lambda j, i: (0, j)),    # W1T tile resident over inner m
            pl.BlockSpec((1, TV), lambda j, i: (0, j)),
        ],
        out_specs=pl.BlockSpec((TM_B, TV), lambda j, i: (i, j)),
        compiler_params=pltpu.CompilerParams(
            dimension_semantics=("parallel", "parallel"),  # leading (vocab) axis feeds both TCs
            vmem_limit_bytes=vmem_limit),
        cost_estimate=pl.CostEstimate(
            flops=2 * M_pad * V * E,
            transcendentals=0,
            bytes_accessed=2 * V * E + grid_v * 2 * M_pad * E + 4 * V
                           + M_pad * V * jnp.dtype(_LM_LOGITS_DTYPE).itemsize),
    )(y, w1t_bf16, d_bias[None, :])
    return logits[:M]


def pooled_fc(h0, w_fc_bf16, b_fc):
    B, H = h0.shape
    TB = 256 if B > 256 else _round_up(B, 8)
    B_pad = _round_up(B, TB)
    if B_pad != B:
        h0 = jnp.pad(h0, ((0, B_pad - B), (0, 0)))
    vmem_limit = _vmem_limit_bytes()
    pooled = pl.pallas_call(
        pooled_fc_kernel,
        out_shape=jax.ShapeDtypeStruct((B_pad, H), jnp.float32),
        grid=(B_pad // TB,),
        in_specs=[
            pl.BlockSpec((TB, H), lambda i: (i, 0)),
            _resident((H, H), lambda i: (0, 0)),          # bf16 weight, single-buffered
            _resident((1, H), lambda i: (0, 0)),
        ],
        out_specs=pl.BlockSpec((TB, H), lambda i: (i, 0)),
        compiler_params=pltpu.CompilerParams(
            dimension_semantics=("parallel",),
            vmem_limit_bytes=vmem_limit),
        cost_estimate=pl.CostEstimate(
            flops=2 * B_pad * H * H,
            transcendentals=B_pad * H,
            bytes_accessed=4 * (2 * B_pad * H + H) + 2 * H * H),
    )(h0, w_fc_bf16, b_fc[None, :])
    return pooled[:B]


# -------------------- transformer backbone (plain-JAX stand-in) -------------

def fourier_former(tp, input_ids, segment_ids, input_mask):
    # TODO(synk): models.FourierFormer source not provided; FNet-style stand-in
    # (ALBERT-factorized embedding + Fourier token mixing + GELU FFN) in plain JAX.
    S = input_ids.shape[1]
    e = tp["tok_embed1"][input_ids]                                  # (B,S,E)
    x = e @ tp["tok_embed2_w"].T + tp["tok_embed2_b"]                # (B,S,H)
    x = x + tp["pos_embed"][None, :S] + tp["seg_embed"][segment_ids]
    x = _layer_norm(x, tp["embed_ln_g"], tp["embed_ln_b"])
    x = x * input_mask[..., None].astype(x.dtype)
    for lyr in tp["layers"]:
        mix = jnp.real(jnp.fft.fft(jnp.fft.fft(x, axis=-1), axis=-2))
        x = _layer_norm(x + mix, lyr["ln1_g"], lyr["ln1_b"])
        ff = _gelu(x @ lyr["ff1_w"].T + lyr["ff1_b"]) @ lyr["ff2_w"].T + lyr["ff2_b"]
        x = _layer_norm(x + ff, lyr["ln2_g"], lyr["ln2_b"])
    return x


# ----------------------------- Generator forward ----------------------------

def generator_forward(params, input_ids, segment_ids, input_mask, masked_pos):
    h = fourier_former(params["transformer"], input_ids, segment_ids, input_mask)  # (B,S,H)
    B, S, H = h.shape
    P = masked_pos.shape[1]

    # pooled / next-sentence head: tanh(fc) in Pallas (lane-dense (B,H) output);
    # the tiny (H,2) classifier matmul stays in plain JAX (last-dim 2 is lane-sparse).
    pooled = pooled_fc(h[:, 0], params["fc_w_bf16"], params["fc_b"])                 # (B, H)
    logits_clsf = pooled @ params["cls_w"].T + params["cls_b"]                       # (B, 2)

    # gather masked positions (== torch.gather after expand) — index glue in JAX
    h_masked = jnp.take_along_axis(h, masked_pos[:, :, None], axis=1)                # (B,P,H)

    logits_lm = mlm_head(h_masked.reshape(B * P, H),
                         params["lin_w_bf16"], params["lin_b"],
                         params["norm_g"], params["norm_b"],
                         params["tok_embed2_w_bf16"],      # (H, E): decoder1(x) == x @ W2
                         params["tok_embed1_T_bf16"],      # (E, V): decoder2(y) == y @ W1^T
                         params["decoder_bias"]).reshape(B, P, -1)                    # (B,P,V)
    return logits_lm, logits_clsf


# ----------------------------- params ---------------------------------------

def init_params(key, cfg):
    def nrm(k, shape, scale=0.02):
        return scale * jax.random.normal(k, shape, jnp.float32)

    keys = iter(jax.random.split(key, 32))
    V, E, H, L, F = cfg["vocab"], cfg["emb"], cfg["hidden"], cfg["max_len"], cfg["ff"]
    layers = []
    for _ in range(cfg["n_layers"]):
        layers.append(dict(
            ln1_g=jnp.ones((H,), jnp.float32), ln1_b=jnp.zeros((H,), jnp.float32),
            ff1_w=nrm(next(keys), (F, H)), ff1_b=jnp.zeros((F,), jnp.float32),
            ff2_w=nrm(next(keys), (H, F)), ff2_b=jnp.zeros((H,), jnp.float32),
            ln2_g=jnp.ones((H,), jnp.float32), ln2_b=jnp.zeros((H,), jnp.float32),
        ))
    tok_embed1 = nrm(next(keys), (V, E))                # Embedding(vocab, emb) (tied decoder2)
    tok_embed2_w = nrm(next(keys), (H, E))              # Linear(emb, hidden).weight
    transformer = dict(
        tok_embed1=tok_embed1,
        tok_embed2_w=tok_embed2_w,
        tok_embed2_b=jnp.zeros((H,), jnp.float32),
        pos_embed=nrm(next(keys), (L, H)),
        seg_embed=nrm(next(keys), (cfg["n_segments"], H)),
        embed_ln_g=jnp.ones((H,), jnp.float32), embed_ln_b=jnp.zeros((H,), jnp.float32),
        layers=layers,
    )
    fc_w = nrm(next(keys), (H, H))
    lin_w = nrm(next(keys), (H, H))
    return dict(
        transformer=transformer,
        # bf16 copies prepared once at init (not per call) for MXU weight streaming:
        #   tok_embed1_T_bf16 is stored transposed (E, V) so the vocab matmul gets a
        #   canonical K x N lane-dense RHS feed with no per-step layout fixup.
        tok_embed1_T_bf16=tok_embed1.T.astype(jnp.bfloat16),
        tok_embed2_w_bf16=tok_embed2_w.astype(jnp.bfloat16),
        fc_w=fc_w, fc_w_bf16=fc_w.astype(jnp.bfloat16), fc_b=jnp.zeros((H,), jnp.float32),
        lin_w=lin_w, lin_w_bf16=lin_w.astype(jnp.bfloat16), lin_b=jnp.zeros((H,), jnp.float32),
        norm_g=jnp.ones((H,), jnp.float32), norm_b=jnp.zeros((H,), jnp.float32),
        cls_w=nrm(next(keys), (2, H)), cls_b=jnp.zeros((2,), jnp.float32),
        decoder_bias=jnp.zeros((V,), jnp.float32),
    )


# ----------------------------- main ------------------------------------------

if __name__ == "__main__":
    cfg = dict(vocab=64, emb=32, hidden=32, max_len=16, n_segments=2, n_layers=2, ff=64)
    params = init_params(jax.random.PRNGKey(0), cfg)

    B, S, P = 2, 8, 4
    k1, k2, k3 = jax.random.split(jax.random.PRNGKey(0), 3)
    input_ids = jax.random.randint(k1, (B, S), 0, cfg["vocab"])
    segment_ids = jax.random.randint(k2, (B, S), 0, cfg["n_segments"])
    input_mask = jnp.ones((B, S), jnp.float32)
    masked_pos = jax.random.randint(k3, (B, P), 0, S)

    logits_lm, logits_clsf = generator_forward(params, input_ids, segment_ids,
                                               input_mask, masked_pos)
    jax.block_until_ready((logits_lm, logits_clsf))
    assert logits_lm.shape == (B, P, cfg["vocab"]), logits_lm.shape
    assert logits_clsf.shape == (B, 2), logits_clsf.shape
    assert bool(jnp.all(jnp.isfinite(logits_lm))) and bool(jnp.all(jnp.isfinite(logits_clsf)))
    print("KERNEL_OK")
</pallas_src>

<mosaic_0001>
module attributes {stable_mosaic.version = 11 : i64} {
  func.func @pooled_fc_kernel(%arg0: i32, %arg1: memref<8x32xf32, #tpu.memory_space<vmem>>, %arg2: memref<32x32xbf16, #tpu.memory_space<vmem>>, %arg3: memref<1x32xf32, #tpu.memory_space<vmem>>, %arg4: memref<8x32xf32, #tpu.memory_space<vmem>>) attributes {dimension_semantics = [#tpu.dimension_semantics<parallel>], iteration_bounds = array<i64: 1>, scalar_prefetch = 0 : i64, scratch_operands = 0 : i64, tpu.core_type = #tpu.core_type<tc>, window_params = [{transform_indices = @transform_0, window_bounds = array<i64: 8, 32>}, {pipeline_mode = #tpu.pipeline_mode<synchronous>, transform_indices = @transform_1, window_bounds = array<i64: 32, 32>}, {pipeline_mode = #tpu.pipeline_mode<synchronous>, transform_indices = @transform_2, window_bounds = array<i64: 1, 32>}, {transform_indices = @transform_3, window_bounds = array<i64: 8, 32>}]} {
    %c0 = arith.constant 0 : index
    %c0_0 = arith.constant 0 : index
    %0 = vector.load %arg1[%c0, %c0_0] : memref<8x32xf32, #tpu.memory_space<vmem>>, vector<8x32xf32>
    %1 = arith.truncf %0 : vector<8x32xf32> to vector<8x32xbf16>
    %c0_1 = arith.constant 0 : index
    %c0_2 = arith.constant 0 : index
    %2 = vector.load %arg2[%c0_1, %c0_2] : memref<32x32xbf16, #tpu.memory_space<vmem>>, vector<32x32xbf16>
    %cst = arith.constant dense<0.000000e+00> : vector<8x32xf32>
    %3 = tpu.matmul %1, %2, %cst {dimension_numbers = #tpu.dot_dimension_numbers<[1], [1], [0], [0], [0, 0, 1, 0], [], []>} : vector<8x32xbf16>, vector<32x32xbf16>, vector<8x32xf32> -> vector<8x32xf32>
    %c0_3 = arith.constant 0 : index
    %c0_4 = arith.constant 0 : index
    %4 = vector.load %arg3[%c0_3, %c0_4] : memref<1x32xf32, #tpu.memory_space<vmem>>, vector<1x32xf32>
    %5 = vector.broadcast %4 : vector<1x32xf32> to vector<8x32xf32>
    %6 = arith.addf %3, %5 : vector<8x32xf32>
    %7 = math.tanh %6 : vector<8x32xf32>
    %c0_5 = arith.constant 0 : index
    %c0_6 = arith.constant 0 : index
    %8 = vector.load %arg4[%c0_5, %c0_6] : memref<8x32xf32, #tpu.memory_space<vmem>>, vector<8x32xf32>
    tpu.vector_store %arg4[%c0_5, %c0_6], %7 {strides = array<i32>} : memref<8x32xf32, #tpu.memory_space<vmem>>, vector<8x32xf32>,
    return
  }
  func.func @transform_0(%arg0: i32) -> (i32, i32) {
    %c0_i32 = arith.constant 0 : i32
    %c0_i32_0 = arith.constant 0 : i32
    return %arg0, %c0_i32 : i32, i32
  }
  func.func @transform_1(%arg0: i32) -> (i32, i32) {
    %c0_i32 = arith.constant 0 : i32
    %c0_i32_0 = arith.constant 0 : i32
    %c0_i32_1 = arith.constant 0 : i32
    return %c0_i32, %c0_i32_0 : i32, i32
  }
  func.func @transform_2(%arg0: i32) -> (i32, i32) {
    %c0_i32 = arith.constant 0 : i32
    %c0_i32_0 = arith.constant 0 : i32
    %c0_i32_1 = arith.constant 0 : i32
    return %c0_i32, %c0_i32_0 : i32, i32
  }
  func.func @transform_3(%arg0: i32) -> (i32, i32) {
    %c0_i32 = arith.constant 0 : i32
    %c0_i32_0 = arith.constant 0 : i32
    return %arg0, %c0_i32 : i32, i32
  }
}

</mosaic_0001>

<bundles_post_ra>
// kernel: tpu_custom_call.1
= control target key start
LH: loop header
LB: loop body
LE: loop exit
PB: predicated region body
PF: predicated region fallthrough
CT: control target
= control target key end

     0   :  { %8 = vsyncpa [#allocation3], 0  ;;  %s308_s0 = inlined_call_operand.hbm [shape: f32[8,32], index: 0, kind: input, shape index: {}]   ;;  %s309_s1 = inlined_call_operand.hbm [shape: bf16[32,32], index: 1, kind: input, shape index: {}]   ;;  %s310_s2 = inlined_call_operand.vmem [shape: f32[1,32], index: 2, kind: input, shape index: {}]   ;;  %s311_s3 = inlined_call_operand.hbm [shape: f32[8,32], index: 3, kind: output, shape index: {}]  }
   0x1   :  { %9 = vsyncpa [#allocation6], 0 }
   0x2   :  { %10 = vsyncpa [#allocation4], 0  ;;  %s231_s12 = smov [#allocation2]   ;;  %s232_s14 = smov [#allocation5]  }
   0x3   :  { %s17_s13 = sshll.u32 %s231_s12, 4  ;;  %s26_s15 = sshll.u32 %s232_s14, 4  ;;  %s18_s13 = int_to_ptr.vmem [resolvable:$true] %s17_s13  ;;  %s258_s15 = int_to_ptr.vmem [resolvable:$true] %s26_s15 }
   0x4   :  { %s159_s18 = scalar_lea.hbm %s308_s0, 128 }
   0x5   :  { %p160_p0 = scmp.ne.s32.totalorder %s308_s0, %s159_s18  ;;  %p163_p1 = scmp.lt.u32.totalorder %s159_s18, %s308_s0 }
   0x7   :  { %p165_p2 = pnand %p163_p1, %p160_p0 }
   0x9   :  { %168 = shalt.err (!%p165_p2)
}
   0xa   :  { %s169_s23 = scalar_lea.vmem %s18_s13, 128  ;;  %p174_p4 = scmp.lt.s32.totalorder %s18_s13, %s18_s13 }
   0xb   :  { %p170_p3 = scmp.ne.s32.totalorder %s18_s13, %s169_s23  ;;  %p175_p5 = scmp.lt.s32.totalorder %s169_s23, %s169_s23 }
   0xd   :  { %p176_p6 = por %p175_p5, %p174_p4 }
   0xf   :  { %p177_p7 = pnand %p176_p6, %p170_p3 }
  0x11   :  { %180 = shalt.err (!%p177_p7)
}
  0x12   :  { %20 = dma.hbm_to_vmem [thread:$0]  %s308_s0, 128, %s18_s13, [#allocation3]  }
  0x13   :  { %s181_s28 = scalar_lea.hbm %s309_s1, 256 }
  0x14   :  { %p182_p8 = scmp.ne.s32.totalorder %s309_s1, %s181_s28  ;;  %p185_p9 = scmp.lt.u32.totalorder %s181_s28, %s309_s1 }
  0x16   :  { %p187_p10 = pnand %p185_p9, %p182_p8 }
  0x18   :  { %190 = shalt.err (!%p187_p10)
}
  0x19   :  { %s191_s6 = scalar_lea.vmem %s258_s15, 256  ;;  %p196_p12 = scmp.lt.s32.totalorder %s258_s15, %s258_s15 }
  0x1a   :  { %p192_p11 = scmp.ne.s32.totalorder %s258_s15, %s191_s6  ;;  %p197_p13 = scmp.lt.s32.totalorder %s191_s6, %s191_s6 }
  0x1c   :  { %p198_p0 = por %p197_p13, %p196_p12 }
  0x1e   :  { %p199_p1 = pnand %p198_p0, %p192_p11 }
  0x20   :  { %202 = shalt.err (!%p199_p1)
}
  0x21   :  { %s233_s0 = smov 64   ;;  %s234_s7 = smov 4  }
  0x22   :  { %32 = dma.hbm_to_vmem [thread:$0]  %s309_s1, 256, %s258_s15, [#allocation6], %s233_s0, %s233_s0, %s234_s7  }
  0x23   :  { %225 = dma.done.wait [#allocation3], 128  }
  0x24   :  { %226 = vsyncadd [#allocation3], 4294967168 }
  0x25   :  { %227 = dma.done.wait [#allocation6], 256  }
  0x26   :  { %228 = vsyncadd [#allocation6], 4294967040  ;;  %v235_v0 = vmov 0.0   ;;  %vm236_vm0 = vmmov 0   ;;  %vm65_vm1 = vcmask 261120   ;;  %v155_v1 = vld [vmem:[#allocation5] sm:$0xff]  }
  0x27   :  { %140 = vmatprep.subr.bf16.mxu0 %v235_v0  ;;  %144 = vmatprep.mubr.msk.bf16.mxu0 %vm236_vm0, %v235_v0  ;;  %v70_v2 = vsel %vm65_vm1, %v155_v1, 0  ;;  %v156_v3 = vld [vmem:[#allocation5 + $0x8] sm:$0xff]   ;;  %v42_v5 = vld [vmem:[#allocation2] sm:$0xff]  ;;  %s237_s11 = smov [#allocation7]  }
  0x28   :  { %141 = vmatpush3.bf16.xpose.msra.mxu0 %v70_v2  ;;  %v73_v4 = vsel %vm65_vm1, %v156_v3, 0  ;;  %v43_v6 = vpack.c.bf16 %v42_v5, %v42_v5  ;;  %v133_v7 = vld [vmem:[%s310_s2] ss:$0 sm:$0xff]  ;;  %s123_s12 = sshll.u32 %s237_s11, 4  ;;  %s124_s12 = int_to_ptr.vmem [resolvable:$true] %s123_s12 }
  0x29   :  { %142 = vmatprep.subr.bf16.mxu0 %v235_v0  ;;  %s203_s13 = scalar_lea.vmem %s124_s12, 128  ;;  %p208_p3 = scmp.lt.s32.totalorder %s124_s12, %s124_s12 }
  0x2a   :  { %p204_p2 = scmp.ne.s32.totalorder %s124_s12, %s203_s13  ;;  %p209_p4 = scmp.lt.s32.totalorder %s203_s13, %s203_s13 }
  0x2c   :  { %p210_p5 = por %p209_p4, %p208_p3 }
  0x2e   :  { %p211_p6 = pnand %p210_p5, %p204_p2 }
  0x30   :  { %143 = vmatpush3.bf16.xpose.msra.mxu0 %v73_v4 }
  0x37   :  { %145 = vmatmul.mubr.msk.bf16.vlgmr.msra.gmra.mrb[0].mxu0 %vm65_vm1, %v43_v6 }
 0x10a   :  { %v109_v8 = vpop.f32.mrb[0].mxu0 }
 0x10b   :  { %v110_v9 = vadd.f32 %v133_v7, %v109_v8  ;;  %v146_v10 = vpop.f32.mrb[1].mxu0 }
 0x10c   :  { %v112_v11 = vpop.f32.mrb[2].mxu0 }
 0x10d   :  { %157 = vtanh.f32 %v110_v9  ;;  %v147_v12 = vpop.f32.mrb[3].mxu0 }
 0x117   :  { %v158_v13 = vpop.eup %157 }
 0x118   :  { %116 = vst.msk [vmem:[#allocation7] sm:$0xff] %vm65_vm1, %v158_v13 }
 0x119   :  { %214 = shalt.err (!%p211_p6)
}
 0x11a   :  { %s215_s15 = scalar_lea.hbm %s311_s3, 128 }
 0x11b   :  { %p216_p7 = scmp.ne.s32.totalorder %s311_s3, %s215_s15  ;;  %p219_p8 = scmp.lt.u32.totalorder %s215_s15, %s311_s3 }
 0x11d   :  { %p221_p9 = pnand %p219_p8, %p216_p7 }
 0x11f   :  { %224 = shalt.err (!%p221_p9)
}
 0x120   :  { %126 = dma.vmem_to_hbm [thread:$0]  %s124_s12, 128, %s311_s3, [#allocation4]  }
 0x121   :  { %229 = dma.done.wait [#allocation4], 128  }
 0x122   :  { %230 = vsyncadd [#allocation4], 4294967168 }
 0x123   :  { %130 = vsyncpa [#allocation3], 1 }
 0x124   :  { %131 = vsyncpa [#allocation6], 1 }
 0x125   :  { %132 = vsyncpa [#allocation4], 1 }

</bundles_post_ra>
